<compile_context>
chip_gen: v6e
topology: v6e:2x2x1
jax: 0.10.0
libtpu: 0.0.40
codegen_flags: <defaults>
</compile_context>

<pallas_src>
import math

import jax
import jax.numpy as jnp
from jax.experimental import pallas as pl
from jax.experimental.pallas import tpu as pltpu


_LANE = 128      # vreg lane width
_SUBLANE = 8     # vreg sublane count (f32)


# ------------------------- Pallas kernel ------------------------------------
def _linear_sigmoid_kernel(x_ref, w_ref, b_ref, o_ref):
    # x_ref: (TM, K_pad)      input rows (zero-padded along K)
    # w_ref: (K_pad, N_pad)   weight transposed to (in, out), zero-padded
    # b_ref: (1, N_pad)       bias (zero-padded)
    # o_ref: (TM, N_pad)      lane-dense output (unmasked 128-wide stores)
    acc = jnp.dot(x_ref[...], w_ref[...], preferred_element_type=jnp.float32)
    z = acc + b_ref[...]                      # bias broadcast over rows (VPU)
    # sigmoid = 1 / (1 + exp(-z)); exp lands on the EUP, all math stays f32.
    o_ref[...] = (1.0 / (1.0 + jnp.exp(-z))).astype(o_ref.dtype)


# ------------------------- wrapper -------------------------------------------
def linear_sigmoid(x, weight, bias, *, max_rows_per_block=512):
    """PyTorch-semantics nn.Linear + Sigmoid: sigmoid(x @ weight.T + bias).

    x: (B, K) f32; weight: (N, K) f32; bias: (N,) f32. Returns (B, N) f32.
    The whole problem runs as a single fused, VMEM-resident GEMM + epilogue
    kernel with lane-dense (128-padded) K and N.
    """
    B, K = x.shape
    N, K_w = weight.shape
    assert K == K_w, (K, K_w)

    K_pad = max(_LANE, pl.cdiv(K, _LANE) * _LANE)
    N_pad = max(_LANE, pl.cdiv(N, _LANE) * _LANE)

    # Row tiling: a single block unless the batch is genuinely large.
    b_rounded = pl.cdiv(B, _SUBLANE) * _SUBLANE
    tm = b_rounded if b_rounded <= max_rows_per_block else max_rows_per_block
    B_pad = pl.cdiv(b_rounded, tm) * tm

    # Zero-pad operands to aligned, lane-dense shapes (tiny one-off copies under
    # jit; padded MXU rows/cols contribute zeros, padded bias lanes only touch
    # columns that are sliced off below).
    x_pad = jnp.zeros((B_pad, K_pad), jnp.float32).at[:B, :K].set(x)
    w_pad = jnp.zeros((K_pad, N_pad), jnp.float32).at[:K, :N].set(weight.T)
    b_pad = jnp.zeros((1, N_pad), jnp.float32).at[0, :N].set(bias)

    out = pl.pallas_call(
        _linear_sigmoid_kernel,
        out_shape=jax.ShapeDtypeStruct((B_pad, N_pad), jnp.float32),
        grid_spec=pltpu.PrefetchScalarGridSpec(
            num_scalar_prefetch=0,
            grid=(B_pad // tm,),                      # (1,) at the example size
            in_specs=[
                pl.BlockSpec((tm, K_pad), lambda i: (i, 0)),
                pl.BlockSpec((K_pad, N_pad), lambda i: (0, 0)),
                pl.BlockSpec((1, N_pad), lambda i: (0, 0)),
            ],
            out_specs=pl.BlockSpec((tm, N_pad), lambda i: (i, 0)),
        ),
        compiler_params=pltpu.CompilerParams(
            dimension_semantics=("parallel",),
        ),
    )(x_pad, w_pad, b_pad)

    return out[:B, :N]


# ------------------------- Model ---------------------------------------------
def init_params(key):
    """Deterministic init mimicking PyTorch nn.Linear defaults
    (uniform +/- 1/sqrt(fan_in) for both weight and bias)."""
    k1, k2 = jax.random.split(key)
    fan_in = 3
    lim = 1.0 / math.sqrt(fan_in)
    w = jax.random.uniform(k1, (1, 3), jnp.float32, -lim, lim)   # (out, in)
    b = jax.random.uniform(k2, (1,), jnp.float32, -lim, lim)
    return (w, b)


@jax.jit
def model_forward(x, params):
    w, b = params
    return linear_sigmoid(x, w, b)   # (B, 1)


def _reference_forward(x, params):
    """Pure-JAX reference for the correctness check."""
    w, b = params
    return jax.nn.sigmoid(x @ w.T + b)


if __name__ == "__main__":
    key = jax.random.PRNGKey(0)
    kx, kp = jax.random.split(key)

    # Input consistent with nn.Linear(3, 1): batch=8, features=3.
    x = jax.random.normal(kx, (8, 3), jnp.float32)
    params = init_params(kp)

    out = model_forward(x, params)
    out = jax.block_until_ready(out)

    assert out.shape == (8, 1), out.shape

    ref = _reference_forward(x, params)
    assert jnp.allclose(out, ref, atol=1e-5, rtol=1e-5), "mismatch vs reference"

    print("KERNEL_OK")
</pallas_src>

<mosaic_0001>
module attributes {stable_mosaic.version = 11 : i64} {
  func.func @_linear_sigmoid_kernel(%arg0: i32, %arg1: memref<8x128xf32, #tpu.memory_space<vmem>>, %arg2: memref<128x128xf32, #tpu.memory_space<vmem>>, %arg3: memref<1x128xf32, #tpu.memory_space<vmem>>, %arg4: memref<8x128xf32, #tpu.memory_space<vmem>>) attributes {dimension_semantics = [#tpu.dimension_semantics<parallel>], iteration_bounds = array<i64: 1>, scalar_prefetch = 0 : i64, scratch_operands = 0 : i64, tpu.core_type = #tpu.core_type<tc>, window_params = [{transform_indices = @transform_0, window_bounds = array<i64: 8, 128>}, {pipeline_mode = #tpu.pipeline_mode<synchronous>, transform_indices = @transform_1, window_bounds = array<i64: 128, 128>}, {pipeline_mode = #tpu.pipeline_mode<synchronous>, transform_indices = @transform_2, window_bounds = array<i64: 1, 128>}, {transform_indices = @transform_3, window_bounds = array<i64: 8, 128>}]} {
    %c0 = arith.constant 0 : index
    %c0_0 = arith.constant 0 : index
    %0 = vector.load %arg1[%c0, %c0_0] : memref<8x128xf32, #tpu.memory_space<vmem>>, vector<8x128xf32>
    %c0_1 = arith.constant 0 : index
    %c0_2 = arith.constant 0 : index
    %1 = vector.load %arg2[%c0_1, %c0_2] : memref<128x128xf32, #tpu.memory_space<vmem>>, vector<128x128xf32>
    %cst = arith.constant dense<0.000000e+00> : vector<8x128xf32>
    %2 = tpu.matmul %0, %1, %cst {dimension_numbers = #tpu.dot_dimension_numbers<[1], [0], [0], [1], [0, 0, 1, 1], [], []>} : vector<8x128xf32>, vector<128x128xf32>, vector<8x128xf32> -> vector<8x128xf32>
    %c0_3 = arith.constant 0 : index
    %c0_4 = arith.constant 0 : index
    %3 = vector.load %arg3[%c0_3, %c0_4] : memref<1x128xf32, #tpu.memory_space<vmem>>, vector<1x128xf32>
    %4 = vector.broadcast %3 : vector<1x128xf32> to vector<8x128xf32>
    %5 = arith.addf %2, %4 : vector<8x128xf32>
    %cst_5 = arith.constant 0.000000e+00 : f32
    %6 = vector.broadcast %cst_5 : f32 to vector<8x128xf32>
    %7 = arith.subf %6, %5 : vector<8x128xf32>
    %8 = math.exp %7 : vector<8x128xf32>
    %cst_6 = arith.constant 1.000000e+00 : f32
    %9 = vector.broadcast %cst_6 : f32 to vector<8x128xf32>
    %10 = arith.addf %9, %8 : vector<8x128xf32>
    %cst_7 = arith.constant 1.000000e+00 : f32
    %11 = vector.broadcast %cst_7 : f32 to vector<8x128xf32>
    %12 = arith.divf %11, %10 : vector<8x128xf32>
    %c0_8 = arith.constant 0 : index
    %c0_9 = arith.constant 0 : index
    %13 = vector.load %arg4[%c0_8, %c0_9] : memref<8x128xf32, #tpu.memory_space<vmem>>, vector<8x128xf32>
    tpu.vector_store %arg4[%c0_8, %c0_9], %12 {strides = array<i32>} : memref<8x128xf32, #tpu.memory_space<vmem>>, vector<8x128xf32>,
    return
  }
  func.func @transform_0(%arg0: i32) -> (i32, i32) {
    %c0_i32 = arith.constant 0 : i32
    %c0_i32_0 = arith.constant 0 : i32
    return %arg0, %c0_i32 : i32, i32
  }
  func.func @transform_1(%arg0: i32) -> (i32, i32) {
    %c0_i32 = arith.constant 0 : i32
    %c0_i32_0 = arith.constant 0 : i32
    %c0_i32_1 = arith.constant 0 : i32
    return %c0_i32, %c0_i32_0 : i32, i32
  }
  func.func @transform_2(%arg0: i32) -> (i32, i32) {
    %c0_i32 = arith.constant 0 : i32
    %c0_i32_0 = arith.constant 0 : i32
    %c0_i32_1 = arith.constant 0 : i32
    return %c0_i32, %c0_i32_0 : i32, i32
  }
  func.func @transform_3(%arg0: i32) -> (i32, i32) {
    %c0_i32 = arith.constant 0 : i32
    %c0_i32_0 = arith.constant 0 : i32
    return %arg0, %c0_i32 : i32, i32
  }
}

</mosaic_0001>

<bundles_post_ra>
// kernel: model_forward.1
= control target key start
LH: loop header
LB: loop body
LE: loop exit
PB: predicated region body
PF: predicated region fallthrough
CT: control target
= control target key end

     0   :  { %v178_v0 = vmov 0.0   ;;  %vm179_vm0 = vmmov 0   ;;  %s257_s1 = inlined_call_operand.vmem [shape: f32[128,128], index: 1, kind: input, shape index: {}]   ;;  %s258_s0 = inlined_call_operand.vmem [shape: f32[8,128], index: 0, kind: input, shape index: {}]   ;;  %s259_s2 = inlined_call_operand.vmem [shape: f32[1,128], index: 2, kind: input, shape index: {}]   ;;  %s260_s3 = inlined_call_operand.vmem [shape: f32[8,128], index: 3, kind: output, shape index: {}]  }
   0x1   :  { %137 = vmatprep.subr.mxu0 %v178_v0  ;;  %v30_v1 = vld [vmem:[%s257_s1 + $0x78] sm:$0xff]  ;;  %v29_v2 = vld [vmem:[%s257_s1 + $0x70] sm:$0xff]  ;;  %169 = vmatprep.mubr.msk.f32.mxu0 %vm179_vm0, %v178_v0  ;;  %v28_v3 = vld [vmem:[%s257_s1 + $0x68] sm:$0xff] }
   0x2   :  { %138 = vmatpush3.msra.mxu0 %v30_v1  ;;  %v27_v4 = vld [vmem:[%s257_s1 + $0x60] sm:$0xff]  ;;  %v26_v5 = vld [vmem:[%s257_s1 + $0x58] sm:$0xff]  ;;  %v25_v6 = vld [vmem:[%s257_s1 + $0x50] sm:$0xff] }
   0x3   :  { %139 = vmatprep.subr.mxu0 %v178_v0  ;;  %v24_v7 = vld [vmem:[%s257_s1 + $0x48] sm:$0xff]  ;;  %v23_v8 = vld [vmem:[%s257_s1 + $0x40] sm:$0xff]  ;;  %v22_v9 = vld [vmem:[%s257_s1 + $0x38] sm:$0xff] }
   0x4   :  { %140 = vmatpush3.msra.mxu0 %v29_v2  ;;  %v21_v10 = vld [vmem:[%s257_s1 + $0x30] sm:$0xff]  ;;  %v20_v11 = vld [vmem:[%s257_s1 + $0x28] sm:$0xff]  ;;  %v19_v12 = vld [vmem:[%s257_s1 + $0x20] sm:$0xff] }
   0x5   :  { %141 = vmatprep.subr.mxu0 %v178_v0  ;;  %v18_v13 = vld [vmem:[%s257_s1 + $0x18] sm:$0xff]  ;;  %v17_v14 = vld [vmem:[%s257_s1 + $0x10] sm:$0xff]  ;;  %v16_v15 = vld [vmem:[%s257_s1 + $0x8] sm:$0xff] }
   0x6   :  { %142 = vmatpush3.msra.mxu0 %v28_v3  ;;  %v15_v16 = vld [vmem:[%s257_s1] sm:$0xff] }
   0x7   :  { %143 = vmatprep.subr.mxu0 %v178_v0  ;;  %v14_v17 = vld [vmem:[%s258_s0] sm:$0xff] }
   0x8   :  { %144 = vmatpush3.msra.mxu0 %v27_v4  ;;  %v119_v18 = vld [vmem:[%s259_s2] ss:$0 sm:$0xff] }
   0x9   :  { %145 = vmatprep.subr.mxu0 %v178_v0 }
   0xa   :  { %146 = vmatpush3.msra.mxu0 %v26_v5 }
   0xb   :  { %147 = vmatprep.subr.mxu0 %v178_v0 }
   0xc   :  { %148 = vmatpush3.msra.mxu0 %v25_v6 }
   0xd   :  { %149 = vmatprep.subr.mxu0 %v178_v0 }
   0xe   :  { %150 = vmatpush3.msra.mxu0 %v24_v7 }
   0xf   :  { %151 = vmatprep.subr.mxu0 %v178_v0 }
  0x10   :  { %152 = vmatpush3.msra.mxu0 %v23_v8 }
  0x11   :  { %153 = vmatprep.subr.mxu0 %v178_v0 }
  0x12   :  { %154 = vmatpush3.msra.mxu0 %v22_v9 }
  0x13   :  { %155 = vmatprep.subr.mxu0 %v178_v0 }
  0x14   :  { %156 = vmatpush3.msra.mxu0 %v21_v10 }
  0x15   :  { %157 = vmatprep.subr.mxu0 %v178_v0 }
  0x16   :  { %158 = vmatpush3.msra.mxu0 %v20_v11 }
  0x17   :  { %159 = vmatprep.subr.mxu0 %v178_v0 }
  0x18   :  { %160 = vmatpush3.msra.mxu0 %v19_v12 }
  0x19   :  { %161 = vmatprep.subr.mxu0 %v178_v0 }
  0x1a   :  { %162 = vmatpush3.msra.mxu0 %v18_v13 }
  0x1b   :  { %163 = vmatprep.subr.mxu0 %v178_v0 }
  0x1c   :  { %164 = vmatpush3.msra.mxu0 %v17_v14 }
  0x1d   :  { %165 = vmatprep.subr.mxu0 %v178_v0 }
  0x1e   :  { %166 = vmatpush3.msra.mxu0 %v16_v15 }
  0x1f   :  { %167 = vmatprep.subr.mxu0 %v178_v0 }
  0x20   :  { %168 = vmatpush3.msra.mxu0 %v15_v16 }
  0x21   :  { %170 = vmatmul.mubr.f32.vlgmr.msra.gmra.mxu0 %v14_v17 }
  0xe1   :  { %v104_v19 = vpop.f32.mrf.mxu0 }
  0xe2   :  { %v105_v20 = vadd.f32 %v119_v18, %v104_v19 }
  0xe3   :  { %v171_v21 = vpop.f32.mrf.mxu0 }
  0xe4   :  { %v108_v22 = vsub.f32 0.0, %v105_v20 }
  0xe6   :  { %v109_v23 = vmul.f32 1.442695, %v108_v22 }
  0xe8   :  { %174 = vpow2.f32 %v109_v23 }
  0xf5   :  { %v175_v24 = vpop.eup %174 }
  0xf6   :  { %v111_v25 = vadd.f32 1.0, %v175_v24 }
  0xf8   :  { %176 = vrcp.f32 %v111_v25 }
 0x105   :  { %v177_v26 = vpop.eup %176 }
 0x106   :  { %114 = vst [vmem:[%s260_s3] sm:$0xff] %v177_v26 }

</bundles_post_ra>
